<compile_context>
chip_gen: v7x
topology: tpu7x:2x2x1
jax: 0.10.0
libtpu: 0.0.40
codegen_flags: <defaults>
</compile_context>

<pallas_src>
import functools

import jax
import jax.numpy as jnp
from jax.experimental import pallas as pl
from jax.experimental.pallas import tpu as pltpu

NEG_SLOPE = 0.1
BN_EPS = 1e-5
ACT_DTYPE = jnp.bfloat16          # inter-layer activation dtype (MXU native)


def _cdiv(a, b):
    return -(-a // b)


def _round_up(a, b):
    return _cdiv(a, b) * b


# ----------------------------- Pallas kernels -------------------------------

def _mm_kernel(x_ref, w_ref, shift_ref, o_ref, acc_ref, *, apply_act, neg_slope):
    """Tiled matmul (bf16 x bf16 -> f32 accumulator) + fused shift/LeakyReLU."""
    @pl.when(pl.program_id(2) == 0)
    def _():
        acc_ref[...] = jnp.zeros_like(acc_ref)

    acc_ref[...] += jnp.dot(x_ref[...], w_ref[...],
                            preferred_element_type=jnp.float32)

    @pl.when(pl.program_id(2) == pl.num_programs(2) - 1)
    def _():
        y = acc_ref[...] + shift_ref[...]
        if apply_act:
            y = jnp.where(y >= 0, y, neg_slope * y)
        o_ref[...] = y.astype(o_ref.dtype)


def _maxpool_kernel(x_ref, o_ref, *, C):
    x = x_ref[...]
    a = jnp.maximum(x[:, 0 * C:1 * C], x[:, 1 * C:2 * C])
    b = jnp.maximum(x[:, 2 * C:3 * C], x[:, 3 * C:4 * C])
    o_ref[...] = jnp.maximum(a, b)


_K_TILE_CANDIDATES = (3584, 2304, 2048, 1792, 1536, 1280, 1152, 1024,
                      896, 768, 640, 512, 384, 256, 128)


def _pick_k_tile(Kp):
    for t in _K_TILE_CANDIDATES:
        if t <= Kp and Kp % t == 0:
            return t
    return 128


@functools.partial(jax.jit, static_argnames=("apply_act", "out_dtype"))
def matmul_shift_act(x, w, shift, *, apply_act, out_dtype):
    """out = act(x @ w + shift).  shift broadcasts over rows; the per-channel
    scale is already folded into w.  bf16 operands, f32 accumulation."""
    M, K = x.shape
    Kw, N = w.shape
    assert K == Kw
    tm = min(512, _round_up(M, 16))
    Mp = _round_up(M, tm)
    Kp = _round_up(K, 128)
    tk = _pick_k_tile(Kp)
    tn = min(2048, _round_up(N, 128))
    Np = _round_up(N, tn)

    x = x.astype(jnp.bfloat16)
    w = w.astype(jnp.bfloat16)
    if (Mp, Kp) != (M, K):
        x = jnp.pad(x, ((0, Mp - M), (0, Kp - K)))
    if (Kp, Np) != (K, N):
        w = jnp.pad(w, ((0, Kp - K), (0, Np - N)))
    s = shift.reshape(1, N).astype(jnp.float32)
    if Np != N:
        s = jnp.pad(s, ((0, 0), (0, Np - N)))

    kernel = functools.partial(_mm_kernel, apply_act=apply_act,
                               neg_slope=NEG_SLOPE)
    out = pl.pallas_call(
        kernel,
        out_shape=jax.ShapeDtypeStruct((Mp, Np), out_dtype),
        grid_spec=pltpu.PrefetchScalarGridSpec(
            num_scalar_prefetch=0,
            grid=(Mp // tm, Np // tn, Kp // tk),
            in_specs=[
                pl.BlockSpec((tm, tk), lambda i, j, k: (i, k)),
                pl.BlockSpec((tk, tn), lambda i, j, k: (k, j)),
                pl.BlockSpec((1, tn), lambda i, j, k: (0, j)),
            ],
            out_specs=pl.BlockSpec((tm, tn), lambda i, j, k: (i, j)),
            scratch_shapes=[pltpu.VMEM((tm, tn), jnp.float32)],
        ),
        compiler_params=pltpu.CompilerParams(
            dimension_semantics=("parallel", "parallel", "arbitrary"),
            vmem_limit_bytes=48 * 1024 * 1024),
    )(x, w, s)
    return out[:M, :N]


@jax.jit
def maxpool2x2_ceil(x):
    """MaxPool2d(kernel=2, stride=2, ceil_mode=True) on an NHWC tensor."""
    N, H, W, C = x.shape
    Ho, Wo = _cdiv(H, 2), _cdiv(W, 2)
    xp = x
    if (2 * Ho, 2 * Wo) != (H, W):
        xp = jnp.pad(x, ((0, 0), (0, 2 * Ho - H), (0, 2 * Wo - W), (0, 0)),
                     constant_values=-jnp.inf)
    # lane-dense layout: each row holds one 2x2 window, channels stay on lanes
    xr = xp.reshape(N, Ho, 2, Wo, 2, C).transpose(0, 1, 3, 2, 4, 5)
    xr = xr.reshape(N * Ho * Wo, 4 * C)
    M = N * Ho * Wo
    tm = min(512, _round_up(M, 16))
    Mp = _round_up(M, tm)
    if Mp != M:
        xr = jnp.pad(xr, ((0, Mp - M), (0, 0)))
    out = pl.pallas_call(
        functools.partial(_maxpool_kernel, C=C),
        out_shape=jax.ShapeDtypeStruct((Mp, C), x.dtype),
        grid=(Mp // tm,),
        in_specs=[pl.BlockSpec((tm, 4 * C), lambda i: (i, 0))],
        out_specs=pl.BlockSpec((tm, C), lambda i: (i, 0)),
        compiler_params=pltpu.CompilerParams(
            dimension_semantics=("parallel",),
            vmem_limit_bytes=48 * 1024 * 1024),
    )(xr)
    return out[:M].reshape(N, Ho, Wo, C)


# ------------------------------ conv wrapper --------------------------------

def conv_layer(x, layer, pad=None, apply_act=True, out_dtype=ACT_DTYPE):
    """Conv2d(stride=1) + folded bias/BatchNorm + LeakyReLU on an NHWC tensor."""
    w_mat, shift, k = layer["w"], layer["shift"], layer["k"]
    if pad is None:
        pad = layer["pad"]
    N, H, W, C = x.shape
    Ho, Wo = H + 2 * pad - k + 1, W + 2 * pad - k + 1
    if pad:
        x = jnp.pad(x, ((0, 0), (pad, pad), (pad, pad), (0, 0)))
    if k == 1:
        patches = x.reshape(N * Ho * Wo, C)
    elif Ho == 1 and Wo == 1:
        patches = x.reshape(N, k * k * C)          # conv61: 7x7 map, 7x7 kernel
    else:
        # im2col; feature ordering (dy, dx, c) matches w.transpose(2, 3, 1, 0)
        patches = jnp.concatenate(
            [x[:, dy:dy + Ho, dx:dx + Wo, :] for dy in range(k) for dx in range(k)],
            axis=-1).reshape(N * Ho * Wo, k * k * C)
    y = matmul_shift_act(patches, w_mat, shift, apply_act=apply_act,
                         out_dtype=out_dtype)
    return y.reshape(N, Ho, Wo, w_mat.shape[1])


# ------------- compact (constant-background) head: conv11 .. pool3 ----------
#
# With padding=100 and a small input, the conv11 output is a per-channel
# constant everywhere except a small data-influenced window.  For every later
# layer the map therefore equals the network's response to an all-zero input
# (which depends only on the distance to the map edges) except on that window.
# We track the window ("patch") exactly and evaluate the zero-input response on
# a reduced-size map whose pooling parities match the full map, then expand it
# by replicating its interior row/column and paste the patch back.

_STAGE_OPS = ("conv12", "pool", "conv21", "conv22", "pool",
              "conv31", "conv32", "conv33", "pool")


def _stage_plan_ok(S, T, lo, hi):
    """Static feasibility check: full map size S, data window [lo, hi),
    reduced background size T, tracked edge-band widths (bt, bb)."""
    bt = bb = 0
    for op in _STAGE_OPS:
        if op == "pool":
            if S % 2 != T % 2:                      # ceil-mode behaviour must match
                return False
            if lo % 2:
                lo -= 1
            if (hi - lo) % 2:
                hi += 1
            if lo < bt + 1 or hi > S - bb - 1:      # alignment rows must be interior
                return False
            lo //= 2
            hi //= 2
            nS, nT = _cdiv(S, 2), _cdiv(T, 2)
            bt = (bt + 1) // 2
            bb = nT - (T - bb) // 2
            S, T = nS, nT
        else:                                       # 3x3 conv, pad=1
            if lo - 2 < bt or hi + 2 > S - bb:      # constant border must be interior
                return False
            lo -= 1
            hi += 1
            bt += 1
            bb += 1
        if not (bt <= T // 2 <= T - 1 - bb):        # reduced map keeps interior centre
            return False
    return True


def _pick_background_size(S, lo, hi):
    if lo < 0 or hi > S:
        return None
    for T in range(8, S + 1):
        if _stage_plan_ok(S, T, lo, hi):
            return T
    return None


def _pad_const(x, lo_pad, hi_pad, const):
    """Pad both spatial dims by (lo_pad, hi_pad) with a per-channel constant."""
    if lo_pad == 0 and hi_pad == 0:
        return x
    N, H, W, C = x.shape
    out = jnp.broadcast_to(const.astype(x.dtype),
                           (N, H + lo_pad + hi_pad, W + lo_pad + hi_pad, C))
    return out.at[:, lo_pad:lo_pad + H, lo_pad:lo_pad + W, :].set(x)


def _run_compact_stage(params, patch, lo, S, bg):
    """Run conv12..pool3 on the data patch and the reduced background in lockstep."""
    for op in _STAGE_OPS:
        t = bg.shape[1]
        const = bg[0, t // 2, t // 2, :]             # interior background value
        if op == "pool":
            if lo % 2:                               # align patch to the pooling grid
                patch = _pad_const(patch, 1, 0, const)
                lo -= 1
            if patch.shape[1] % 2:
                patch = _pad_const(patch, 0, 1, const)
            patch = maxpool2x2_ceil(patch)
            bg = maxpool2x2_ceil(bg)
            lo //= 2
            S = _cdiv(S, 2)
        else:
            layer = params[op]
            assert layer["k"] == 3 and layer["pad"] == 1
            # values around the window equal the interior background constant
            patch = conv_layer(_pad_const(patch, 2, 2, const), layer, pad=0)
            bg = conv_layer(bg, layer)               # pad=1, same as the real map
            lo -= 1
    return patch, lo, S, bg


def _head_to_pool3_compact(x, params, T):
    N, H, W, _ = x.shape
    p11 = params["conv11"]
    k11, pad11 = p11["k"], p11["pad"]
    S = H + 2 * pad11 - (k11 - 1)                    # virtual conv11 output size
    lo = pad11 - (k11 - 1)                           # data window offset
    # conv11 restricted to its data-influenced window == conv11 with pad = k-1
    patch = conv_layer(x, p11, pad=k11 - 1)
    # zero-input response of conv11: LeakyReLU(shift), constant everywhere
    shift11 = p11["shift"]
    c11 = jnp.where(shift11 >= 0, shift11, NEG_SLOPE * shift11)
    bg = jnp.broadcast_to(c11.astype(ACT_DTYPE), (1, T, T, c11.shape[0]))
    # conv12 .. pool3 on (patch, background)
    patch, lo, S, bg = _run_compact_stage(params, patch, lo, S, bg)
    # reconstruct the full-size post-pool3 map
    t = bg.shape[1]
    q = t // 2
    idx = jnp.concatenate([jnp.arange(q + 1, dtype=jnp.int32),
                           jnp.full((S - t,), q, dtype=jnp.int32),
                           jnp.arange(q + 1, t, dtype=jnp.int32)])
    full_bg = bg[0][idx][:, idx]                     # (S, S, C)
    out = jnp.broadcast_to(full_bg[None], (N,) + full_bg.shape)
    p = patch.shape[1]
    out = out.at[:, lo:lo + p, lo:lo + p, :].set(patch)
    return out


def _head_to_pool3_dense(x, params):
    """Generic fallback: evaluate conv11 .. pool3 on the full-size maps."""
    h = conv_layer(x, params["conv11"])
    for op in _STAGE_OPS:
        h = maxpool2x2_ceil(h) if op == "pool" else conv_layer(h, params[op])
    return h


# ------------------------------- forward ------------------------------------

def _tail(x, params, N, H, W):
    for name in ("conv41", "conv42", "conv43"):
        x = conv_layer(x, params[name])
    x = maxpool2x2_ceil(x)
    for name in ("conv51", "conv52", "conv53"):
        x = conv_layer(x, params[name])
    x = maxpool2x2_ceil(x)
    x = conv_layer(x, params["conv61"])              # 7x7 valid -> 1x1
    x = conv_layer(x, params["conv71"])              # 1x1
    x = conv_layer(x, params["conv72"])              # 1x1 (+ LeakyReLU, no BN)

    # ConvTranspose2d(nc, nc, 64, stride=32, bias=False) on a 1x1 map == matmul.
    assert x.shape[1] == 1 and x.shape[2] == 1, "upsample path assumes 1x1 feature map"
    # TODO(synk): general-size ConvTranspose2d (overlapping scatter-add) not
    # implemented; only the 1x1-input case produced by this architecture is handled.
    w_up = params["upsample_w"]
    cin_u, cout_u, kh, kw = w_up.shape
    xf = x.reshape(N, cin_u)
    wm = w_up.reshape(cin_u, cout_u * kh * kw)
    up = matmul_shift_act(xf, wm, jnp.zeros((cout_u * kh * kw,), jnp.float32),
                          apply_act=False, out_dtype=jnp.float32)
    up = up.reshape(N, cout_u, kh, kw)               # already NCHW
    return up[:, :, 19:19 + H, 19:19 + W]            # crop like PyTorch


def fcn32_forward(x_nchw, params):
    N, _, H, W = x_nchw.shape
    x = jnp.transpose(x_nchw, (0, 2, 3, 1)).astype(ACT_DTYPE)    # NCHW -> NHWC

    p11 = params["conv11"]
    plan_T = None
    if H == W and p11["pad"] >= p11["k"] - 1:
        S0 = H + 2 * p11["pad"] - (p11["k"] - 1)
        lo0 = p11["pad"] - (p11["k"] - 1)
        hi0 = lo0 + H + (p11["k"] - 1)
        plan_T = _pick_background_size(S0, lo0, hi0)

    if plan_T is not None:
        h = _head_to_pool3_compact(x, params, plan_T)
    else:
        h = _head_to_pool3_dense(x, params)
    # Dropout layers are identity in eval mode.
    return _tail(h, params, N, H, W)


# ------------------------------ parameters ----------------------------------

_CONV_DEFS = [
    ("conv11", 128, 3, 100), ("conv12", 128, 3, 1),
    ("conv21", 256, 3, 1), ("conv22", 256, 3, 1),
    ("conv31", 256, 3, 1), ("conv32", 256, 3, 1), ("conv33", 256, 3, 1),
    ("conv41", 512, 3, 1), ("conv42", 512, 3, 1), ("conv43", 512, 3, 1),
    ("conv51", 512, 3, 1), ("conv52", 512, 3, 1), ("conv53", 512, 3, 1),
    ("conv61", 4096, 7, 0), ("conv71", 4096, 1, 0),
]


def _conv_params(key, cin, cout, k, pad, with_bn):
    kv, kg, kb, k1, k2, k3, k4 = jax.random.split(key, 7)
    fan_in = cin * k * k
    v = jax.random.normal(kv, (cout, cin, k, k), jnp.float32) * jnp.sqrt(2.0 / fan_in)
    norm = jnp.sqrt(jnp.sum(v * v, axis=(1, 2, 3), keepdims=True) + 1e-12)
    g = norm[:, 0, 0, 0] * (1.0 + 0.05 * jax.random.normal(kg, (cout,), jnp.float32))
    w = g[:, None, None, None] * v / norm            # weight_norm: w = g * v / ||v||
    bias = 0.01 * jax.random.normal(kb, (cout,), jnp.float32)
    if with_bn:
        gamma = 1.0 + 0.05 * jax.random.normal(k1, (cout,), jnp.float32)
        beta = 0.05 * jax.random.normal(k2, (cout,), jnp.float32)
        r_mean = 0.05 * jax.random.normal(k3, (cout,), jnp.float32)
        r_var = 1.0 + 0.05 * jnp.abs(jax.random.normal(k4, (cout,), jnp.float32))
        scale = gamma / jnp.sqrt(r_var + BN_EPS)     # eval-mode BN folded into conv
        shift = beta + (bias - r_mean) * scale
    else:
        scale = jnp.ones((cout,), jnp.float32)
        shift = bias
    # fold the per-channel scale into the weight matrix; shift stays in epilogue
    w_mat = (jnp.transpose(w, (2, 3, 1, 0)).reshape(k * k * cin, cout)
             * scale[None, :]).astype(jnp.bfloat16)
    return {"w": w_mat, "shift": shift, "k": k, "pad": pad}


def init_params(key, channels_in, num_classes):
    params = {}
    cin = channels_in
    for name, cout, k, pad in _CONV_DEFS:
        key, sub = jax.random.split(key)
        params[name] = _conv_params(sub, cin, cout, k, pad, with_bn=True)
        cin = cout
    key, sub = jax.random.split(key)
    params["conv72"] = _conv_params(sub, 4096, num_classes, 1, 0, with_bn=False)
    key, sub = jax.random.split(key)
    fan = num_classes * 64 * 64
    params["upsample_w"] = (jax.random.normal(
        sub, (num_classes, num_classes, 64, 64), jnp.float32) / jnp.sqrt(fan))
    return params


# --------------------------------- main --------------------------------------

if __name__ == "__main__":
    key = jax.random.PRNGKey(0)
    k_params, k_x = jax.random.split(key)
    channels_in, num_classes = 4, 5
    params = init_params(k_params, channels_in, num_classes)
    x = jax.random.normal(k_x, (2, channels_in, 16, 16), jnp.float32)

    out = fcn32_forward(x, params)
    out = jax.block_until_ready(out)

    assert out.shape == (2, num_classes, 16, 16), out.shape
    assert bool(jnp.all(jnp.isfinite(out)))
    print("KERNEL_OK")
</pallas_src>

<mosaic_0001>
module attributes {stable_mosaic.version = 11 : i64} {
  func.func @_mm_kernel(%arg0: i32, %arg1: i32, %arg2: i32, %arg3: memref<512x128xbf16, #tpu.memory_space<vmem>>, %arg4: memref<128x128xbf16, #tpu.memory_space<vmem>>, %arg5: memref<1x128xf32, #tpu.memory_space<vmem>>, %arg6: memref<512x128xbf16, #tpu.memory_space<vmem>>, %arg7: memref<512x128xf32, #tpu.memory_space<vmem>>) attributes {dimension_semantics = [#tpu.dimension_semantics<parallel>, #tpu.dimension_semantics<parallel>, #tpu.dimension_semantics<arbitrary>], iteration_bounds = array<i64: 2, 1, 1>, scalar_prefetch = 0 : i64, scratch_operands = 1 : i64, tpu.core_type = #tpu.core_type<tc>, window_params = [{transform_indices = @transform_0, window_bounds = array<i64: 512, 128>}, {transform_indices = @transform_1, window_bounds = array<i64: 128, 128>}, {transform_indices = @transform_2, window_bounds = array<i64: 1, 128>}, {transform_indices = @transform_3, window_bounds = array<i64: 512, 128>}]} {
    %c0_i32 = arith.constant 0 : i32
    %0 = arith.cmpi eq, %arg2, %c0_i32 : i32
    %1 = arith.extui %0 : i1 to i32
    %c0_i32_0 = arith.constant 0 : i32
    %2 = arith.cmpi ne, %1, %c0_i32_0 : i32
    scf.if %2 {
      %cst_10 = arith.constant 0.000000e+00 : f32
      %12 = vector.broadcast %cst_10 : f32 to vector<512x128xf32>
      %c0_11 = arith.constant 0 : index
      %c0_12 = arith.constant 0 : index
      %13 = vector.load %arg7[%c0_11, %c0_12] : memref<512x128xf32, #tpu.memory_space<vmem>>, vector<512x128xf32>
      tpu.vector_store %arg7[%c0_11, %c0_12], %12 {strides = array<i32>} : memref<512x128xf32, #tpu.memory_space<vmem>>, vector<512x128xf32>,
    } else {
    }
    %c0 = arith.constant 0 : index
    %c0_1 = arith.constant 0 : index
    %3 = vector.load %arg7[%c0, %c0_1] : memref<512x128xf32, #tpu.memory_space<vmem>>, vector<512x128xf32>
    %c0_2 = arith.constant 0 : index
    %c0_3 = arith.constant 0 : index
    %4 = vector.load %arg3[%c0_2, %c0_3] : memref<512x128xbf16, #tpu.memory_space<vmem>>, vector<512x128xbf16>
    %c0_4 = arith.constant 0 : index
    %c0_5 = arith.constant 0 : index
    %5 = vector.load %arg4[%c0_4, %c0_5] : memref<128x128xbf16, #tpu.memory_space<vmem>>, vector<128x128xbf16>
    %cst = arith.constant dense<0.000000e+00> : vector<512x128xf32>
    %6 = tpu.matmul %4, %5, %cst {dimension_numbers = #tpu.dot_dimension_numbers<[1], [0], [0], [1], [0, 0, 1, 1], [], []>} : vector<512x128xbf16>, vector<128x128xbf16>, vector<512x128xf32> -> vector<512x128xf32>
    %7 = arith.addf %3, %6 : vector<512x128xf32>
    %c0_6 = arith.constant 0 : index
    %c0_7 = arith.constant 0 : index
    %8 = vector.load %arg7[%c0_6, %c0_7] : memref<512x128xf32, #tpu.memory_space<vmem>>, vector<512x128xf32>
    tpu.vector_store %arg7[%c0_6, %c0_7], %7 {strides = array<i32>} : memref<512x128xf32, #tpu.memory_space<vmem>>, vector<512x128xf32>,
    %c0_i32_8 = arith.constant 0 : i32
    %9 = arith.cmpi eq, %arg2, %c0_i32_8 : i32
    %10 = arith.extui %9 : i1 to i32
    %c0_i32_9 = arith.constant 0 : i32
    %11 = arith.cmpi ne, %10, %c0_i32_9 : i32
    scf.if %11 {
      %c0_10 = arith.constant 0 : index
      %c0_11 = arith.constant 0 : index
      %12 = vector.load %arg7[%c0_10, %c0_11] : memref<512x128xf32, #tpu.memory_space<vmem>>, vector<512x128xf32>
      %c0_12 = arith.constant 0 : index
      %c0_13 = arith.constant 0 : index
      %13 = vector.load %arg5[%c0_12, %c0_13] : memref<1x128xf32, #tpu.memory_space<vmem>>, vector<1x128xf32>
      %14 = vector.broadcast %13 : vector<1x128xf32> to vector<512x128xf32>
      %15 = arith.addf %12, %14 : vector<512x128xf32>
      %cst_14 = arith.constant 0.000000e+00 : f32
      %16 = vector.broadcast %cst_14 : f32 to vector<512x128xf32>
      %17 = arith.cmpf oge, %15, %16 : vector<512x128xf32>
      %cst_15 = arith.constant 1.000000e-01 : f32
      %18 = vector.broadcast %cst_15 : f32 to vector<512x128xf32>
      %19 = arith.mulf %18, %15 : vector<512x128xf32>
      %20 = arith.select %17, %15, %19 : vector<512x128xi1>, vector<512x128xf32>
      %21 = arith.truncf %20 : vector<512x128xf32> to vector<512x128xbf16>
      %c0_16 = arith.constant 0 : index
      %c0_17 = arith.constant 0 : index
      %22 = vector.load %arg6[%c0_16, %c0_17] : memref<512x128xbf16, #tpu.memory_space<vmem>>, vector<512x128xbf16>
      tpu.vector_store %arg6[%c0_16, %c0_17], %21 {strides = array<i32>} : memref<512x128xbf16, #tpu.memory_space<vmem>>, vector<512x128xbf16>,
    } else {
    }
    return
  }
  func.func @transform_0(%arg0: i32, %arg1: i32, %arg2: i32) -> (i32, i32) {
    %c0_i32 = arith.constant 0 : i32
    return %arg0, %arg2 : i32, i32
  }
  func.func @transform_1(%arg0: i32, %arg1: i32, %arg2: i32) -> (i32, i32) {
    %c0_i32 = arith.constant 0 : i32
    return %arg2, %arg1 : i32, i32
  }
  func.func @transform_2(%arg0: i32, %arg1: i32, %arg2: i32) -> (i32, i32) {
    %c0_i32 = arith.constant 0 : i32
    %c0_i32_0 = arith.constant 0 : i32
    return %c0_i32, %arg1 : i32, i32
  }
  func.func @transform_3(%arg0: i32, %arg1: i32, %arg2: i32) -> (i32, i32) {
    %c0_i32 = arith.constant 0 : i32
    return %arg0, %arg1 : i32, i32
  }
}

</mosaic_0001>

<bundles_post_ra>
// kernel: matmul_shift_act.1
= control target key start
LH: loop header
LB: loop body
LE: loop exit
PB: predicated region body
PF: predicated region fallthrough
CT: control target
= control target key end

     0   :  { %s2507_s12 = smov 0   ;;  %s2509_s13 = smov 0   ;;  %s2717_s0 = inlined_call_operand.vmem [shape: bf16[1024,128], index: 0, kind: input, shape index: {}]   ;;  %s2718_s1 = inlined_call_operand.vmem [shape: bf16[128,128], index: 1, kind: input, shape index: {}]   ;;  %s2719_s2 = inlined_call_operand.vmem [shape: f32[1,128], index: 2, kind: input, shape index: {}]   ;;  %s2720_s3 = inlined_call_operand.vmem [shape: bf16[1024,128], index: 3, kind: output, shape index: {}]  }
   0x1   :  { %s2511_s14 = smov 0  }
   0x2 LB: > { %s32_s15 = sadd.s32 1, %s2481_s13  ;;  %p1896_p0 = scmp.ge.s32.totalorder %s2485_s14, 1  ;;  %s2485_s14 = sphi %s2511_s14, %s13_s14   ;;  %s2481_s13 = sphi %s2509_s13, %s2722_s13   ;;  %s2477_s12 = sphi %s2507_s12, %s2721_s12  }
   0x3   : > { %p34_p1 = scmp.ge.s32.totalorder %s32_s15, 2  ;;  %p188_p2 = scmp.lt.s32.totalorder %s2485_s14, 3 }
   0x5   : > { %s2724_s15 = smov (%p34_p1, %s32_s15), 0  ;;  %p189_p3 = pnand %p1896_p0, %p188_p2 }
   0x6   : > { %v2423_v0 = vld [vmem:[%s2718_s1] sm:$0xff] (!%p189_p3)   ;;  %s1897_s18 = sshll.u32 (!%p189_p3), %s2477_s12, 6  ;;  %v2424_v1 = vld [vmem:[%s2718_s1 + $0x8] sm:$0xff] (!%p189_p3)   ;;  %v2425_v2 = vld [vmem:[%s2718_s1 + $0x10] sm:$0xff] (!%p189_p3)  }
   0x7   : > { %192 = sbr.rel (%p189_p3) target bundleno = 328 (0x148), region = 32  ;;  %p230_p4 = scmp.lt.s32.totalorder (!%p189_p3), %s1897_s18, 127  ;;  %2303 = vmatprep.subr.bf16.mxu0 (!%p189_p3), %v2423_v0  ;;  %2383 = vmatprep.subr.bf16.mxu1 (!%p189_p3), %v2423_v0  ;;  %v2426_v3 = vld [vmem:[%s2718_s1 + $0x18] sm:$0xff] (!%p189_p3)   ;;  %v2427_v6 = vld [vmem:[%s2718_s1 + $0x20] sm:$0xff] (!%p189_p3)   ;;  %v2428_v7 = vld [vmem:[%s2718_s1 + $0x28] sm:$0xff] (!%p189_p3)  }
   0x8   : > { %2304 = vmatpush3.bf16.msra.mxu0 (!%p189_p3), %v2423_v0  ;;  %2391 = vmatpush3.bf16.msra.mxu1 (!%p189_p3), %v2423_v0  ;;  %v2429_v8 = vld [vmem:[%s2718_s1 + $0x30] sm:$0xff] (!%p189_p3)   ;;  %v2430_v9 = vld [vmem:[%s2718_s1 + $0x38] sm:$0xff] (!%p189_p3)   ;;  %v2594_v40 = vld [vmem:[%s2719_s2] ss:$0 sm:$0xff] (!%p189_p3) }
   0x9   : > { %2305 = vmatprep.subr.bf16.mxu0 (!%p189_p3), %v2424_v1  ;;  %2384 = vmatprep.subr.bf16.mxu1 (!%p189_p3), %v2424_v1 }
   0xc   : > { %2306 = vmatpush3.bf16.msra.mxu0 (!%p189_p3), %v2424_v1  ;;  %2392 = vmatpush3.bf16.msra.mxu1 (!%p189_p3), %v2424_v1 }
   0xd   : > { %2307 = vmatprep.subr.bf16.mxu0 (!%p189_p3), %v2425_v2  ;;  %2385 = vmatprep.subr.bf16.mxu1 (!%p189_p3), %v2425_v2 }
   0xe   : > { %s2726_s18 = smov (!%p230_p4, %s1897_s18), 127 }
   0xf   : > { %s1898_s23 = sshll.u32 %s2726_s18, 2 }
  0x10   : > { %s2542_s26 = scalar_lea.vmem %s2717_s0, %s1898_s23  ;;  %2308 = vmatpush3.bf16.msra.mxu0 %v2425_v2  ;;  %2393 = vmatpush3.bf16.msra.mxu1 %v2425_v2  ;;  %s2611_s17 = scalar_lea.vmem %s2720_s3, %s1898_s23 }
  0x11   : > { %v2431_v4 = vld [vmem:[%s2542_s26] sm:$0xff]   ;;  %2309 = vmatprep.subr.bf16.mxu0 %v2426_v3  ;;  %2386 = vmatprep.subr.bf16.mxu1 %v2426_v3  ;;  %v2433_v10 = vld [vmem:[%s2542_s26 + $0x8] sm:$0xff]   ;;  %v2435_v12 = vld [vmem:[%s2542_s26 + $0x10] sm:$0xff]  }
  0x12   : > { %v2432_v5 = vld [vmem:[%s2542_s26 + $0x80] sm:$0xff]   ;;  %2319 = vmatprep.mubr.bf16.mxu0 %v2431_v4  ;;  %v2434_v11 = vld [vmem:[%s2542_s26 + $0x88] sm:$0xff]   ;;  %v2436_v13 = vld [vmem:[%s2542_s26 + $0x90] sm:$0xff]  }
  0x13   : > { %2351 = vmatprep.mubr.bf16.mxu1 %v2432_v5  ;;  %v2437_v14 = vld [vmem:[%s2542_s26 + $0x18] sm:$0xff]   ;;  %v2439_v16 = vld [vmem:[%s2542_s26 + $0x20] sm:$0xff]   ;;  %v2441_v18 = vld [vmem:[%s2542_s26 + $0x28] sm:$0xff]  }
  0x14   : > { %2310 = vmatpush3.bf16.msra.mxu0 %v2426_v3  ;;  %2394 = vmatpush3.bf16.msra.mxu1 %v2426_v3  ;;  %v2438_v15 = vld [vmem:[%s2542_s26 + $0x98] sm:$0xff]   ;;  %v2440_v17 = vld [vmem:[%s2542_s26 + $0xa0] sm:$0xff]   ;;  %v2442_v19 = vld [vmem:[%s2542_s26 + $0xa8] sm:$0xff]  }
  0x15   : > { %2311 = vmatprep.subr.bf16.mxu0 %v2427_v6  ;;  %2387 = vmatprep.subr.bf16.mxu1 %v2427_v6  ;;  %v2443_v20 = vld [vmem:[%s2542_s26 + $0x30] sm:$0xff]   ;;  %v2445_v22 = vld [vmem:[%s2542_s26 + $0x38] sm:$0xff]   ;;  %v2447_v24 = vld [vmem:[%s2542_s26 + $0x40] sm:$0xff]  }
  0x16   : > { %v2444_v21 = vld [vmem:[%s2542_s26 + $0xb0] sm:$0xff]   ;;  %v2446_v23 = vld [vmem:[%s2542_s26 + $0xb8] sm:$0xff]   ;;  %v2448_v25 = vld [vmem:[%s2542_s26 + $0xc0] sm:$0xff]  }
  0x17   : > { %v2449_v26 = vld [vmem:[%s2542_s26 + $0x48] sm:$0xff]   ;;  %v2451_v28 = vld [vmem:[%s2542_s26 + $0x50] sm:$0xff]   ;;  %v2453_v30 = vld [vmem:[%s2542_s26 + $0x58] sm:$0xff]  }
  0x18   : > { %2312 = vmatpush3.bf16.msra.mxu0 %v2427_v6  ;;  %2395 = vmatpush3.bf16.msra.mxu1 %v2427_v6  ;;  %v2450_v27 = vld [vmem:[%s2542_s26 + $0xc8] sm:$0xff]   ;;  %v2452_v29 = vld [vmem:[%s2542_s26 + $0xd0] sm:$0xff]   ;;  %v2454_v31 = vld [vmem:[%s2542_s26 + $0xd8] sm:$0xff]  }
  0x19   : > { %2313 = vmatprep.subr.bf16.mxu0 %v2428_v7  ;;  %2388 = vmatprep.subr.bf16.mxu1 %v2428_v7  ;;  %v2455_v32 = vld [vmem:[%s2542_s26 + $0x60] sm:$0xff]   ;;  %v2457_v34 = vld [vmem:[%s2542_s26 + $0x68] sm:$0xff]   ;;  %v2459_v36 = vld [vmem:[%s2542_s26 + $0x70] sm:$0xff]  }
  0x1a   : > { %v2456_v33 = vld [vmem:[%s2542_s26 + $0xe0] sm:$0xff]   ;;  %v2458_v35 = vld [vmem:[%s2542_s26 + $0xe8] sm:$0xff]   ;;  %v2460_v37 = vld [vmem:[%s2542_s26 + $0xf0] sm:$0xff]  }
  0x1b   : > { %v2461_v38 = vld [vmem:[%s2542_s26 + $0x78] sm:$0xff]  }
  0x1c   : > { %2314 = vmatpush3.bf16.msra.mxu0 %v2428_v7  ;;  %2396 = vmatpush3.bf16.msra.mxu1 %v2428_v7  ;;  %v2462_v39 = vld [vmem:[%s2542_s26 + $0xf8] sm:$0xff]  }
  0x1d   : > { %2315 = vmatprep.subr.bf16.mxu0 %v2429_v8  ;;  %2389 = vmatprep.subr.bf16.mxu1 %v2429_v8 }
  0x20   : > { %2316 = vmatpush3.bf16.msra.mxu0 %v2429_v8  ;;  %2397 = vmatpush3.bf16.msra.mxu1 %v2429_v8 }
  0x21   : > { %2317 = vmatprep.subr.bf16.mxu0 %v2430_v9  ;;  %2390 = vmatprep.subr.bf16.mxu1 %v2430_v9 }
  0x24   : > { %2318 = vmatpush3.bf16.msra.mxu0 %v2430_v9  ;;  %2398 = vmatpush3.bf16.msra.mxu1 %v2430_v9 }
  0x27   : > { %2320 = vmatmul.mubr.bf16.vlgmr.msra.gmra.mrb[0].mxu0 %v2433_v10  ;;  %2352 = vmatmul.mubr.bf16.vlgmr.msra.gmra.mrb[0].mxu1 %v2434_v11 }
  0x28   : > { %2323 = vmatprep.mubr.bf16.mxu0 %v2435_v12  ;;  %2355 = vmatprep.mubr.bf16.mxu1 %v2436_v13 }
  0x2f   : > { %2324 = vmatmul.mubr.bf16.gmra.mrb[4].mxu0 %v2437_v14  ;;  %2356 = vmatmul.mubr.bf16.gmra.mrb[4].mxu1 %v2438_v15 }
  0x30   : > { %2327 = vmatprep.mubr.bf16.mxu0 %v2439_v16  ;;  %2359 = vmatprep.mubr.bf16.mxu1 %v2440_v17 }
  0x37   : > { %2328 = vmatmul.mubr.bf16.gmra.mrb[8].mxu0 %v2441_v18  ;;  %2360 = vmatmul.mubr.bf16.gmra.mrb[8].mxu1 %v2442_v19 }
  0x38   : > { %2331 = vmatprep.mubr.bf16.mxu0 %v2443_v20  ;;  %2363 = vmatprep.mubr.bf16.mxu1 %v2444_v21 }
  0x3f   : > { %2332 = vmatmul.mubr.bf16.gmra.mrb[12].mxu0 %v2445_v22  ;;  %2364 = vmatmul.mubr.bf16.gmra.mrb[12].mxu1 %v2446_v23 }
  0x40   : > { %2335 = vmatprep.mubr.bf16.mxu0 %v2447_v24  ;;  %2367 = vmatprep.mubr.bf16.mxu1 %v2448_v25 }
  0x47   : > { %2336 = vmatmul.mubr.bf16.gmra.mrb[16].mxu0 %v2449_v26  ;;  %2368 = vmatmul.mubr.bf16.gmra.mrb[16].mxu1 %v2450_v27 }
  0x48   : > { %2339 = vmatprep.mubr.bf16.mxu0 %v2451_v28  ;;  %2371 = vmatprep.mubr.bf16.mxu1 %v2452_v29 }
  0x4f   : > { %2340 = vmatmul.mubr.bf16.gmra.mrb[20].mxu0 %v2453_v30  ;;  %2372 = vmatmul.mubr.bf16.gmra.mrb[20].mxu1 %v2454_v31 }
  0x50   : > { %2343 = vmatprep.mubr.bf16.mxu0 %v2455_v32  ;;  %2375 = vmatprep.mubr.bf16.mxu1 %v2456_v33 }
  0x57   : > { %2344 = vmatmul.mubr.bf16.gmra.mrb[24].mxu0 %v2457_v34  ;;  %2376 = vmatmul.mubr.bf16.gmra.mrb[24].mxu1 %v2458_v35 }
  0x58   : > { %2347 = vmatprep.mubr.bf16.mxu0 %v2459_v36  ;;  %2379 = vmatprep.mubr.bf16.mxu1 %v2460_v37 }
  0x5f   : > { %2348 = vmatmul.mubr.bf16.gmra.mrb[28].mxu0 %v2461_v38  ;;  %2380 = vmatmul.mubr.bf16.gmra.mrb[28].mxu1 %v2462_v39 }
  0xfa   : > { %v2321_v41 = vpop.f32.mrb[0].mxu0  ;;  %v2353_v42 = vpop.f32.mrb[0].mxu1 }
  0xfb   : > { %v1205_v43 = vadd.f32 %v2321_v41, %v2594_v40  ;;  %v1237_v44 = vadd.f32 %v2353_v42, %v2594_v40  ;;  %v746_v45 = vpop.f32.mrb[1].mxu0  ;;  %v874_v46 = vpop.f32.mrb[1].mxu1 }
  0xfc   : > { %v1203_v47 = vadd.f32 %v2594_v40, %v746_v45  ;;  %v1235_v48 = vadd.f32 %v2594_v40, %v874_v46  ;;  %v2322_v49 = vpop.f32.mrb[2].mxu0  ;;  %v2354_v50 = vpop.f32.mrb[2].mxu1 }
  0xfd   : > { %vm1269_vm0 = vcmp.ge.f32.partialorder %v1205_v43, 0.0  ;;  %v1333_v51 = vmul.f32 0.1, %v1205_v43  ;;  %vm1301_vm1 = vcmp.ge.f32.partialorder %v1237_v44, 0.0  ;;  %v1365_v52 = vmul.f32 0.1, %v1237_v44 }
  0xfe   : > { %vm1267_vm2 = vcmp.ge.f32.partialorder %v1203_v47, 0.0  ;;  %v1331_v53 = vmul.f32 0.1, %v1203_v47  ;;  %vm1299_vm3 = vcmp.ge.f32.partialorder %v1235_v48, 0.0  ;;  %v1363_v54 = vmul.f32 0.1, %v1235_v48 }
  0xff   : > { %v1206_v55 = vadd.f32 %v2322_v49, %v2594_v40  ;;  %v1238_v56 = vadd.f32 %v2354_v50, %v2594_v40  ;;  %v749_v57 = vpop.f32.mrb[3].mxu0  ;;  %v877_v58 = vpop.f32.mrb[3].mxu1  ;;  %v1397_v59 = vsel %vm1269_vm0, %v1205_v43, %v1333_v51  ;;  %v1429_v60 = vsel %vm1301_vm1, %v1237_v44, %v1365_v52 }
 0x100   : > { %v1204_v61 = vadd.f32 %v2594_v40, %v749_v57  ;;  %v1236_v62 = vadd.f32 %v2594_v40, %v877_v58  ;;  %v1395_v3 = vsel %vm1267_vm2, %v1203_v47, %v1331_v53  ;;  %v1427_v4 = vsel %vm1299_vm3, %v1235_v48, %v1363_v54 }
 0x101   : > { %vm1270_vm4 = vcmp.ge.f32.partialorder %v1206_v55, 0.0  ;;  %v1334_v63 = vmul.f32 0.1, %v1206_v55  ;;  %vm1302_vm5 = vcmp.ge.f32.partialorder %v1238_v56, 0.0  ;;  %v1366_v0 = vmul.f32 0.1, %v1238_v56 }
 0x102   : > { %vm1268_vm6 = vcmp.ge.f32.partialorder %v1204_v61, 0.0  ;;  %v1332_v1 = vmul.f32 0.1, %v1204_v61  ;;  %vm1300_vm7 = vcmp.ge.f32.partialorder %v1236_v62, 0.0  ;;  %v1364_v2 = vmul.f32 0.1, %v1236_v62 }
 0x103   : > { %v1398_v5 = vsel %vm1270_vm4, %v1206_v55, %v1334_v63  ;;  %v1430_v6 = vsel %vm1302_vm5, %v1238_v56, %v1366_v0  ;;  %v2325_v7 = vpop.f32.mrb[4].mxu0  ;;  %v2357_v8 = vpop.f32.mrb[4].mxu1 }
 0x104   : > { %v2080_v9 = vpack.c.bf16 %v1398_v5, %v1397_v59  ;;  %v2160_v10 = vpack.c.bf16 %v1430_v6, %v1429_v60  ;;  %v1396_v11 = vsel %vm1268_vm6, %v1204_v61, %v1332_v1  ;;  %v1428_v12 = vsel %vm1300_vm7, %v1236_v62, %v1364_v2  ;;  %v762_v13 = vpop.f32.mrb[5].mxu0  ;;  %v890_v14 = vpop.f32.mrb[5].mxu1 }
 0x105   : > { %v2075_v15 = vpack.c.bf16 %v1396_v11, %v1395_v3  ;;  %v2155_v16 = vpack.c.bf16 %v1428_v12, %v1427_v4  ;;  %v1209_v17 = vadd.f32 %v2325_v7, %v2594_v40  ;;  %v1241_v18 = vadd.f32 %v2357_v8, %v2594_v40  ;;  %v2326_v19 = vpop.f32.mrb[6].mxu0  ;;  %v2358_v20 = vpop.f32.mrb[6].mxu1 }
 0x106   : > { %2232 = vst [vmem:[%s2611_s17 + $0x8] sm:$0xff] %v2080_v9   ;;  %2248 = vst [vmem:[%s2611_s17 + $0x88] sm:$0xff] %v2160_v10   ;;  %v1207_v21 = vadd.f32 %v2594_v40, %v762_v13  ;;  %v1239_v22 = vadd.f32 %v2594_v40, %v890_v14  ;;  %v1210_v23 = vadd.f32 %v2326_v19, %v2594_v40  ;;  %v765_v25 = vpop.f32.mrb[7].mxu0  ;;  %v893_v26 = vpop.f32.mrb[7].mxu1 }
 0x107   : > { %v1242_v24 = vadd.f32 %v2358_v20, %v2594_v40  ;;  %2076 = vst [vmem:[%s2611_s17] sm:$0xff] %v2075_v15   ;;  %2247 = vst [vmem:[%s2611_s17 + $0x80] sm:$0xff] %v2155_v16   ;;  %vm1273_vm8 = vcmp.ge.f32.partialorder %v1209_v17, 0.0  ;;  %v1337_v27 = vmul.f32 0.1, %v1209_v17  ;;  %vm1305_vm9 = vcmp.ge.f32.partialorder %v1241_v18, 0.0 }
 0x108   : > { %v1369_v28 = vmul.f32 0.1, %v1241_v18  ;;  %vm1271_vm10 = vcmp.ge.f32.partialorder %v1207_v21, 0.0  ;;  %v1335_v29 = vmul.f32 0.1, %v1207_v21  ;;  %vm1303_vm11 = vcmp.ge.f32.partialorder %v1239_v22, 0.0 }
 0x109   : > { %v1367_v30 = vmul.f32 0.1, %v1239_v22  ;;  %v1401_v31 = vsel %vm1273_vm8, %v1209_v17, %v1337_v27  ;;  %vm1274_vm12 = vcmp.ge.f32.partialorder %v1210_v23, 0.0  ;;  %v1338_v33 = vmul.f32 0.1, %v1210_v23 }
 0x10a   : > { %v1433_v32 = vsel %vm1305_vm9, %v1241_v18, %v1369_v28  ;;  %v1399_v34 = vsel %vm1271_vm10, %v1207_v21, %v1335_v29  ;;  %vm1306_vm13 = vcmp.ge.f32.partialorder %v1242_v24, 0.0  ;;  %v1370_v36 = vmul.f32 0.1, %v1242_v24  ;;  %v2329_v37 = vpop.f32.mrb[8].mxu0  ;;  %v2361_v38 = vpop.f32.mrb[8].mxu1 }
 0x10b   : > { %v1431_v35 = vsel %vm1303_vm11, %v1239_v22, %v1367_v30  ;;  %v1402_v39 = vsel %vm1274_vm12, %v1210_v23, %v1338_v33  ;;  %v1208_v41 = vadd.f32 %v2594_v40, %v765_v25  ;;  %v1240_v42 = vadd.f32 %v2594_v40, %v893_v26  ;;  %v778_v44 = vpop.f32.mrb[9].mxu0  ;;  %v906_v45 = vpop.f32.mrb[9].mxu1 }
 0x10c   : > { %v1213_v43 = vadd.f32 %v2329_v37, %v2594_v40  ;;  %v2090_v46 = vpack.c.bf16 %v1402_v39, %v1401_v31  ;;  %v1434_v47 = vsel %vm1306_vm13, %v1242_v24, %v1370_v36  ;;  %v1245_v48 = vadd.f32 %v2361_v38, %v2594_v40  ;;  %v2330_v50 = vpop.f32.mrb[10].mxu0  ;;  %v2362_v51 = vpop.f32.mrb[10].mxu1 }
 0x10d   : > { %v1211_v49 = vadd.f32 %v2594_v40, %v778_v44  ;;  %v2170_v52 = vpack.c.bf16 %v1434_v47, %v1433_v32  ;;  %vm1272_vm14 = vcmp.ge.f32.partialorder %v1208_v41, 0.0  ;;  %v1336_v53 = vmul.f32 0.1, %v1208_v41  ;;  %v781_v54 = vpop.f32.mrb[11].mxu0  ;;  %v909_v55 = vpop.f32.mrb[11].mxu1 }
 0x10e   : > { %vm1304_vm15 = vcmp.ge.f32.partialorder %v1240_v42, 0.0  ;;  %2234 = vst [vmem:[%s2611_s17 + $0x18] sm:$0xff] %v2090_v46   ;;  %v1368_v56 = vmul.f32 0.1, %v1240_v42  ;;  %vm1277_vm0 = vcmp.ge.f32.partialorder %v1213_v43, 0.0  ;;  %vm1309_vm1 = vcmp.ge.f32.partialorder %v1245_v48, 0.0 }
 0x10f   : > { %v1341_v57 = vmul.f32 0.1, %v1213_v43  ;;  %2250 = vst [vmem:[%s2611_s17 + $0x98] sm:$0xff] %v2170_v52   ;;  %v1400_v58 = vsel %vm1272_vm14, %v1208_v41, %v1336_v53  ;;  %v1373_v59 = vmul.f32 0.1, %v1245_v48  ;;  %vm1275_vm2 = vcmp.ge.f32.partialorder %v1211_v49, 0.0 }
 0x110   : > { %v1339_v60 = vmul.f32 0.1, %v1211_v49  ;;  %v2085_v61 = vpack.c.bf16 %v1400_v58, %v1399_v34  ;;  %v1432_v62 = vsel %vm1304_vm15, %v1240_v42, %v1368_v56  ;;  %v1243_v0 = vadd.f32 %v2594_v40, %v906_v45 }
 0x111   : > { %v1405_v63 = vsel %vm1277_vm0, %v1213_v43, %v1341_v57  ;;  %v2165_v1 = vpack.c.bf16 %v1432_v62, %v1431_v35  ;;  %v1437_v2 = vsel %vm1309_vm1, %v1245_v48, %v1373_v59  ;;  %v1214_v4 = vadd.f32 %v2330_v50, %v2594_v40 }
 0x112   : > { %v1403_v3 = vsel %vm1275_vm2, %v1211_v49, %v1339_v60  ;;  %2233 = vst [vmem:[%s2611_s17 + $0x10] sm:$0xff] %v2085_v61   ;;  %vm1307_vm3 = vcmp.ge.f32.partialorder %v1243_v0, 0.0  ;;  %v1371_v5 = vmul.f32 0.1, %v1243_v0  ;;  %v1246_v6 = vadd.f32 %v2362_v51, %v2594_v40  ;;  %v2333_v8 = vpop.f32.mrb[12].mxu0  ;;  %v2365_v9 = vpop.f32.mrb[12].mxu1 }
 0x113   : > { %v1212_v7 = vadd.f32 %v2594_v40, %v781_v54  ;;  %2249 = vst [vmem:[%s2611_s17 + $0x90] sm:$0xff] %v2165_v1   ;;  %vm1278_vm4 = vcmp.ge.f32.partialorder %v1214_v4, 0.0  ;;  %v1342_v10 = vmul.f32 0.1, %v1214_v4  ;;  %v1244_v11 = vadd.f32 %v2594_v40, %v909_v55  ;;  %v794_v13 = vpop.f32.mrb[13].mxu0  ;;  %v922_v14 = vpop.f32.mrb[13].mxu1 }
 0x114   : > { %v1217_v12 = vadd.f32 %v2333_v8, %v2594_v40  ;;  %v1435_v15 = vsel %vm1307_vm3, %v1243_v0, %v1371_v5  ;;  %vm1310_vm5 = vcmp.ge.f32.partialorder %v1246_v6, 0.0  ;;  %v1374_v16 = vmul.f32 0.1, %v1246_v6  ;;  %v2334_v17 = vpop.f32.mrb[14].mxu0  ;;  %v2366_v18 = vpop.f32.mrb[14].mxu1 }
 0x115   : > { %vm1276_vm6 = vcmp.ge.f32.partialorder %v1212_v7, 0.0  ;;  %v1406_v19 = vsel %vm1278_vm4, %v1214_v4, %v1342_v10  ;;  %v1340_v20 = vmul.f32 0.1, %v1212_v7  ;;  %vm1308_vm7 = vcmp.ge.f32.partialorder %v1244_v11, 0.0  ;;  %v797_v22 = vpop.f32.mrb[15].mxu0  ;;  %v925_v26 = vpop.f32.mrb[15].mxu1 }
 0x116   : > { %v1372_v21 = vmul.f32 0.1, %v1244_v11  ;;  %v2100_v23 = vpack.c.bf16 %v1406_v19, %v1405_v63  ;;  %v1438_v24 = vsel %vm1310_vm5, %v1246_v6, %v1374_v16  ;;  %vm1281_vm8 = vcmp.ge.f32.partialorder %v1217_v12, 0.0 }
 0x117   : > { %v1345_v25 = vmul.f32 0.1, %v1217_v12  ;;  %v2180_v27 = vpack.c.bf16 %v1438_v24, %v1437_v2  ;;  %v1404_v28 = vsel %vm1276_vm6, %v1212_v7, %v1340_v20  ;;  %v1249_v30 = vadd.f32 %v2365_v9, %v2594_v40 }
 0x118   : > { %v1436_v29 = vsel %vm1308_vm7, %v1244_v11, %v1372_v21  ;;  %2236 = vst [vmem:[%s2611_s17 + $0x28] sm:$0xff] %v2100_v23   ;;  %v2095_v31 = vpack.c.bf16 %v1404_v28, %v1403_v3  ;;  %v1215_v34 = vadd.f32 %v2594_v40, %v794_v13  ;;  %v1247_v36 = vadd.f32 %v2594_v40, %v922_v14 }
 0x119   : > { %v2175_v32 = vpack.c.bf16 %v1436_v29, %v1435_v15  ;;  %v1409_v33 = vsel %vm1281_vm8, %v1217_v12, %v1345_v25  ;;  %2252 = vst [vmem:[%s2611_s17 + $0xa8] sm:$0xff] %v2180_v27   ;;  %vm1313_vm9 = vcmp.ge.f32.partialorder %v1249_v30, 0.0  ;;  %v1377_v35 = vmul.f32 0.1, %v1249_v30 }
 0x11a   : > { %v1218_v37 = vadd.f32 %v2334_v17, %v2594_v40  ;;  %2235 = vst [vmem:[%s2611_s17 + $0x20] sm:$0xff] %v2095_v31   ;;  %vm1279_vm10 = vcmp.ge.f32.partialorder %v1215_v34, 0.0  ;;  %v1343_v38 = vmul.f32 0.1, %v1215_v34  ;;  %v1250_v39 = vadd.f32 %v2366_v18, %v2594_v40  ;;  %v2337_v42 = vpop.f32.mrb[16].mxu0  ;;  %v2369_v43 = vpop.f32.mrb[16].mxu1 }
 0x11b   : > { %2251 = vst [vmem:[%s2611_s17 + $0xa0] sm:$0xff] %v2175_v32   ;;  %v1216_v41 = vadd.f32 %v2594_v40, %v797_v22  ;;  %v1441_v44 = vsel %vm1313_vm9, %v1249_v30, %v1377_v35  ;;  %vm1311_vm11 = vcmp.ge.f32.partialorder %v1247_v36, 0.0  ;;  %v1375_v45 = vmul.f32 0.1, %v1247_v36  ;;  %v810_v46 = vpop.f32.mrb[17].mxu0  ;;  %v938_v47 = vpop.f32.mrb[17].mxu1 }
 0x11c   : > { %vm1282_vm12 = vcmp.ge.f32.partialorder %v1218_v37, 0.0  ;;  %v1407_v48 = vsel %vm1279_vm10, %v1215_v34, %v1343_v38  ;;  %v1346_v49 = vmul.f32 0.1, %v1218_v37  ;;  %vm1314_vm13 = vcmp.ge.f32.partialorder %v1250_v39, 0.0  ;;  %v2338_v51 = vpop.f32.mrb[18].mxu0  ;;  %v2370_v55 = vpop.f32.mrb[18].mxu1 }
 0x11d   : > { %v1378_v50 = vmul.f32 0.1, %v1250_v39  ;;  %v1439_v52 = vsel %vm1311_vm11, %v1247_v36, %v1375_v45  ;;  %vm1280_vm14 = vcmp.ge.f32.partialorder %v1216_v41, 0.0  ;;  %v1344_v53 = vmul.f32 0.1, %v1216_v41  ;;  %v813_v56 = vpop.f32.mrb[19].mxu0 }
 0x11e   : > { %v1248_v54 = vadd.f32 %v2594_v40, %v925_v26  ;;  %v1410_v57 = vsel %vm1282_vm12, %v1218_v37, %v1346_v49  ;;  %v1221_v59 = vadd.f32 %v2337_v42, %v2594_v40  ;;  %v1253_v60 = vadd.f32 %v2369_v43, %v2594_v40  ;;  %v941_v61 = vpop.f32.mrb[19].mxu1 }
 0x11f   : > { %v1442_v58 = vsel %vm1314_vm13, %v1250_v39, %v1378_v50  ;;  %v2110_v62 = vpack.c.bf16 %v1410_v57, %v1409_v33  ;;  %v1408_v0 = vsel %vm1280_vm14, %v1216_v41, %v1344_v53  ;;  %v1219_v5 = vadd.f32 %v2594_v40, %v810_v46 }
 0x120   : > { %v2190_v63 = vpack.c.bf16 %v1442_v58, %v1441_v44  ;;  %vm1312_vm15 = vcmp.ge.f32.partialorder %v1248_v54, 0.0  ;;  %v2105_v1 = vpack.c.bf16 %v1408_v0, %v1407_v48  ;;  %v1376_v2 = vmul.f32 0.1, %v1248_v54 }
 0x121   : > { %vm1285_vm0 = vcmp.ge.f32.partialorder %v1221_v59, 0.0  ;;  %v1349_v3 = vmul.f32 0.1, %v1221_v59  ;;  %2238 = vst [vmem:[%s2611_s17 + $0x38] sm:$0xff] %v2110_v62   ;;  %vm1317_vm1 = vcmp.ge.f32.partialorder %v1253_v60, 0.0  ;;  %v1251_v6 = vadd.f32 %v2594_v40, %v938_v47 }
 0x122   : > { %2254 = vst [vmem:[%s2611_s17 + $0xb8] sm:$0xff] %v2190_v63   ;;  %v1381_v4 = vmul.f32 0.1, %v1253_v60  ;;  %2237 = vst [vmem:[%s2611_s17 + $0x30] sm:$0xff] %v2105_v1   ;;  %v1440_v7 = vsel %vm1312_vm15, %v1248_v54, %v1376_v2  ;;  %v1222_v9 = vadd.f32 %v2338_v51, %v2594_v40  ;;  %v1254_v10 = vadd.f32 %v2370_v55, %v2594_v40  ;;  %v2341_v11 = vpop.f32.mrb[20].mxu0  ;;  %v2373_v12 = vpop.f32.mrb[20].mxu1 }
 0x123   : > { %v1413_v8 = vsel %vm1285_vm0, %v1221_v59, %v1349_v3  ;;  %v2185_v13 = vpack.c.bf16 %v1440_v7, %v1439_v52  ;;  %vm1283_vm2 = vcmp.ge.f32.partialorder %v1219_v5, 0.0  ;;  %v1347_v15 = vmul.f32 0.1, %v1219_v5  ;;  %v826_v16 = vpop.f32.mrb[21].mxu0  ;;  %v954_v17 = vpop.f32.mrb[21].mxu1 }
 0x124   : > { %v1445_v14 = vsel %vm1317_vm1, %v1253_v60, %v1381_v4  ;;  %vm1315_vm3 = vcmp.ge.f32.partialorder %v1251_v6, 0.0  ;;  %v1379_v18 = vmul.f32 0.1, %v1251_v6  ;;  %vm1286_vm4 = vcmp.ge.f32.partialorder %v1222_v9, 0.0  ;;  %v2342_v23 = vpop.f32.mrb[22].mxu0  ;;  %v2374_v24 = vpop.f32.mrb[22].mxu1 }
 0x125   : > { %v1350_v19 = vmul.f32 0.1, %v1222_v9  ;;  %2253 = vst [vmem:[%s2611_s17 + $0xb0] sm:$0xff] %v2185_v13   ;;  %v1411_v20 = vsel %vm1283_vm2, %v1219_v5, %v1347_v15  ;;  %vm1318_vm5 = vcmp.ge.f32.partialorder %v1254_v10, 0.0  ;;  %v1382_v21 = vmul.f32 0.1, %v1254_v10 }
 0x126   : > { %v1220_v22 = vadd.f32 %v2594_v40, %v813_v56  ;;  %v1443_v25 = vsel %vm1315_vm3, %v1251_v6, %v1379_v18  ;;  %v1252_v27 = vadd.f32 %v2594_v40, %v941_v61  ;;  %v1225_v28 = vadd.f32 %v2341_v11, %v2594_v40  ;;  %v829_v29 = vpop.f32.mrb[23].mxu0  ;;  %v957_v30 = vpop.f32.mrb[23].mxu1 }
 0x127   : > { %v1414_v26 = vsel %vm1286_vm4, %v1222_v9, %v1350_v19  ;;  %v1446_v32 = vsel %vm1318_vm5, %v1254_v10, %v1382_v21  ;;  %v1257_v38 = vadd.f32 %v2373_v12, %v2594_v40  ;;  %v1223_v39 = vadd.f32 %v2594_v40, %v826_v16 }
 0x128   : > { %v2120_v31 = vpack.c.bf16 %v1414_v26, %v1413_v8  ;;  %vm1284_vm6 = vcmp.ge.f32.partialorder %v1220_v22, 0.0  ;;  %v1348_v33 = vmul.f32 0.1, %v1220_v22  ;;  %v2200_v34 = vpack.c.bf16 %v1446_v32, %v1445_v14 }
 0x129   : > { %vm1316_vm7 = vcmp.ge.f32.partialorder %v1252_v27, 0.0  ;;  %v1380_v35 = vmul.f32 0.1, %v1252_v27  ;;  %vm1289_vm8 = vcmp.ge.f32.partialorder %v1225_v28, 0.0  ;;  %v1353_v37 = vmul.f32 0.1, %v1225_v28 }
 0x12a   : > { %2240 = vst [vmem:[%s2611_s17 + $0x48] sm:$0xff] %v2120_v31   ;;  %v1412_v36 = vsel %vm1284_vm6, %v1220_v22, %v1348_v33  ;;  %2256 = vst [vmem:[%s2611_s17 + $0xc8] sm:$0xff] %v2200_v34   ;;  %v1255_v43 = vadd.f32 %v2594_v40, %v954_v17  ;;  %v1226_v44 = vadd.f32 %v2342_v23, %v2594_v40  ;;  %v2345_v45 = vpop.f32.mrb[24].mxu0  ;;  %v2377_v46 = vpop.f32.mrb[24].mxu1  ;;  %vm1321_vm9 = vcmp.ge.f32.partialorder %v1257_v38, 0.0 }
 0x12b   : > { %v2115_v41 = vpack.c.bf16 %v1412_v36, %v1411_v20  ;;  %v1444_v42 = vsel %vm1316_vm7, %v1252_v27, %v1380_v35  ;;  %v1385_v48 = vmul.f32 0.1, %v1257_v38  ;;  %v842_v49 = vpop.f32.mrb[25].mxu0  ;;  %v970_v50 = vpop.f32.mrb[25].mxu1  ;;  %v1417_v51 = vsel %vm1289_vm8, %v1225_v28, %v1353_v37 }
 0x12c   : > { %v2195_v47 = vpack.c.bf16 %v1444_v42, %v1443_v25  ;;  %vm1287_vm10 = vcmp.ge.f32.partialorder %v1223_v39, 0.0  ;;  %v1351_v52 = vmul.f32 0.1, %v1223_v39  ;;  %v1383_v53 = vmul.f32 0.1, %v1255_v43  ;;  %v2346_v56 = vpop.f32.mrb[26].mxu0 }
 0x12d   : > { %2239 = vst [vmem:[%s2611_s17 + $0x40] sm:$0xff] %v2115_v41   ;;  %vm1319_vm11 = vcmp.ge.f32.partialorder %v1255_v43, 0.0  ;;  %vm1290_vm12 = vcmp.ge.f32.partialorder %v1226_v44, 0.0  ;;  %v1354_v54 = vmul.f32 0.1, %v1226_v44  ;;  %v1258_v55 = vadd.f32 %v2374_v24, %v2594_v40  ;;  %v2378_v57 = vpop.f32.mrb[26].mxu1 }
 0x12e   : > { %2255 = vst [vmem:[%s2611_s17 + $0xc0] sm:$0xff] %v2195_v47   ;;  %v1449_v58 = vsel %vm1321_vm9, %v1257_v38, %v1385_v48  ;;  %v1415_v59 = vsel %vm1287_vm10, %v1223_v39, %v1351_v52  ;;  %v1224_v60 = vadd.f32 %v2594_v40, %v829_v29  ;;  %v1256_v61 = vadd.f32 %v2594_v40, %v957_v30  ;;  %v845_v62 = vpop.f32.mrb[27].mxu0  ;;  %v973_v63 = vpop.f32.mrb[27].mxu1 }
 0x12f   : > { %v1418_v0 = vsel %vm1290_vm12, %v1226_v44, %v1354_v54  ;;  %vm1322_vm13 = vcmp.ge.f32.partialorder %v1258_v55, 0.0  ;;  %v1386_v1 = vmul.f32 0.1, %v1258_v55  ;;  %v1229_v2 = vadd.f32 %v2345_v45, %v2594_v40 }
 0x130   : > { %v2130_v3 = vpack.c.bf16 %v1418_v0, %v1417_v51  ;;  %vm1288_vm14 = vcmp.ge.f32.partialorder %v1224_v60, 0.0  ;;  %v1352_v4 = vmul.f32 0.1, %v1224_v60  ;;  %vm1320_vm15 = vcmp.ge.f32.partialorder %v1256_v61, 0.0 }
 0x131   : > { %v1450_v5 = vsel %vm1322_vm13, %v1258_v55, %v1386_v1  ;;  %v1384_v6 = vmul.f32 0.1, %v1256_v61  ;;  %vm1293_vm0 = vcmp.ge.f32.partialorder %v1229_v2, 0.0  ;;  %v1357_v7 = vmul.f32 0.1, %v1229_v2 }
 0x132   : > { %2242 = vst [vmem:[%s2611_s17 + $0x58] sm:$0xff] %v2130_v3   ;;  %v2210_v8 = vpack.c.bf16 %v1450_v5, %v1449_v58  ;;  %v1416_v9 = vsel %vm1288_vm14, %v1224_v60, %v1352_v4  ;;  %v1261_v10 = vadd.f32 %v2377_v46, %v2594_v40  ;;  %v1227_v11 = vadd.f32 %v2594_v40, %v842_v49  ;;  %v2349_v12 = vpop.f32.mrb[28].mxu0  ;;  %v2381_v13 = vpop.f32.mrb[28].mxu1 }
 0x133   : > { %v1447_v14 = vsel %vm1319_vm11, %v1255_v43, %v1383_v53  ;;  %v2125_v15 = vpack.c.bf16 %v1416_v9, %v1415_v59  ;;  %v1448_v16 = vsel %vm1320_vm15, %v1256_v61, %v1384_v6  ;;  %v1259_v17 = vadd.f32 %v2594_v40, %v970_v50  ;;  %v858_v18 = vpop.f32.mrb[29].mxu0  ;;  %v986_v19 = vpop.f32.mrb[29].mxu1 }
 0x134   : > { %2258 = vst [vmem:[%s2611_s17 + $0xd8] sm:$0xff] %v2210_v8   ;;  %v2205_v20 = vpack.c.bf16 %v1448_v16, %v1447_v14  ;;  %vm1325_vm1 = vcmp.ge.f32.partialorder %v1261_v10, 0.0  ;;  %v1389_v21 = vmul.f32 0.1, %v1261_v10  ;;  %vm1291_vm2 = vcmp.ge.f32.partialorder %v1227_v11, 0.0  ;;  %v2350_v22 = vpop.f32.mrb[30].mxu0 }
 0x135   : > { %v2382_v23 = vpop.f32.mrb[30].mxu1  ;;  %2241 = vst [vmem:[%s2611_s17 + $0x50] sm:$0xff] %v2125_v15   ;;  %v1421_v24 = vsel %vm1293_vm0, %v1229_v2, %v1357_v7  ;;  %v1355_v25 = vmul.f32 0.1, %v1227_v11  ;;  %vm1323_vm3 = vcmp.ge.f32.partialorder %v1259_v17, 0.0  ;;  %v1230_v26 = vadd.f32 %v2346_v56, %v2594_v40  ;;  %v861_v27 = vpop.f32.mrb[31].mxu0 }
 0x136   : > { %2257 = vst [vmem:[%s2611_s17 + $0xd0] sm:$0xff] %v2205_v20   ;;  %v1387_v28 = vmul.f32 0.1, %v1259_v17  ;;  %v1262_v29 = vadd.f32 %v2378_v57, %v2594_v40  ;;  %v1228_v30 = vadd.f32 %v2594_v40, %v845_v62  ;;  %v1260_v31 = vadd.f32 %v2594_v40, %v973_v63  ;;  %v989_v32 = vpop.f32.mrb[31].mxu1 }
 0x137   : > { %v1453_v33 = vsel %vm1325_vm1, %v1261_v10, %v1389_v21  ;;  %v1419_v34 = vsel %vm1291_vm2, %v1227_v11, %v1355_v25  ;;  %vm1294_vm4 = vcmp.ge.f32.partialorder %v1230_v26, 0.0  ;;  %v1358_v35 = vmul.f32 0.1, %v1230_v26 }
 0x138   : > { %vm1326_vm5 = vcmp.ge.f32.partialorder %v1262_v29, 0.0  ;;  %v1390_v36 = vmul.f32 0.1, %v1262_v29  ;;  %vm1292_vm6 = vcmp.ge.f32.partialorder %v1228_v30, 0.0  ;;  %v1356_v37 = vmul.f32 0.1, %v1228_v30 }
 0x139   : > { %v1422_v38 = vsel %vm1294_vm4, %v1230_v26, %v1358_v35  ;;  %vm1324_vm7 = vcmp.ge.f32.partialorder %v1260_v31, 0.0  ;;  %v1388_v39 = vmul.f32 0.1, %v1260_v31  ;;  %v1233_v41 = vadd.f32 %v2349_v12, %v2594_v40 }
 0x13a   : > { %v2140_v42 = vpack.c.bf16 %v1422_v38, %v1421_v24  ;;  %v1454_v43 = vsel %vm1326_vm5, %v1262_v29, %v1390_v36  ;;  %v1420_v44 = vsel %vm1292_vm6, %v1228_v30, %v1356_v37  ;;  %v1265_v45 = vadd.f32 %v2381_v13, %v2594_v40 }
 0x13b   : > { %v1451_v46 = vsel %vm1323_vm3, %v1259_v17, %v1387_v28  ;;  %v2220_v47 = vpack.c.bf16 %v1454_v43, %v1453_v33  ;;  %v2135_v48 = vpack.c.bf16 %v1420_v44, %v1419_v34  ;;  %v1452_v49 = vsel %vm1324_vm7, %v1260_v31, %v1388_v39 }
 0x13c   : > { %2244 = vst [vmem:[%s2611_s17 + $0x68] sm:$0xff] %v2140_v42   ;;  %v2215_v50 = vpack.c.bf16 %v1452_v49, %v1451_v46  ;;  %vm1297_vm8 = vcmp.ge.f32.partialorder %v1233_v41, 0.0  ;;  %v1361_v51 = vmul.f32 0.1, %v1233_v41  ;;  %v1393_v52 = vmul.f32 0.1, %v1265_v45 }
 0x13d   : > { %2260 = vst [vmem:[%s2611_s17 + $0xe8] sm:$0xff] %v2220_v47   ;;  %2243 = vst [vmem:[%s2611_s17 + $0x60] sm:$0xff] %v2135_v48   ;;  %v1231_v53 = vadd.f32 %v2594_v40, %v858_v18  ;;  %v1263_v54 = vadd.f32 %v2594_v40, %v986_v19  ;;  %v1234_v55 = vadd.f32 %v2350_v22, %v2594_v40  ;;  %vm1329_vm9 = vcmp.ge.f32.partialorder %v1265_v45, 0.0 }
 0x13e   : > { %v1266_v56 = vadd.f32 %v2382_v23, %v2594_v40  ;;  %2259 = vst [vmem:[%s2611_s17 + $0xe0] sm:$0xff] %v2215_v50   ;;  %v1232_v57 = vadd.f32 %v2594_v40, %v861_v27  ;;  %v1264_v58 = vadd.f32 %v2594_v40, %v989_v32  ;;  %v1425_v59 = vsel %vm1297_vm8, %v1233_v41, %v1361_v51 }
 0x13f   : > { %vm1295_vm10 = vcmp.ge.f32.partialorder %v1231_v53, 0.0  ;;  %v1359_v60 = vmul.f32 0.1, %v1231_v53  ;;  %v1391_v61 = vmul.f32 0.1, %v1263_v54  ;;  %vm1298_vm11 = vcmp.ge.f32.partialorder %v1234_v55, 0.0 }
 0x140   : > { %v1362_v62 = vmul.f32 0.1, %v1234_v55  ;;  %vm1330_vm12 = vcmp.ge.f32.partialorder %v1266_v56, 0.0  ;;  %v1394_v63 = vmul.f32 0.1, %v1266_v56  ;;  %v1457_v0 = vsel %vm1329_vm9, %v1265_v45, %v1393_v52 }
 0x141   : > { %vm1327_vm13 = vcmp.ge.f32.partialorder %v1263_v54, 0.0  ;;  %vm1296_vm14 = vcmp.ge.f32.partialorder %v1232_v57, 0.0  ;;  %v1360_v1 = vmul.f32 0.1, %v1232_v57  ;;  %vm1328_vm15 = vcmp.ge.f32.partialorder %v1264_v58, 0.0 }
 0x142   : > { %v1426_v2 = vsel %vm1298_vm11, %v1234_v55, %v1362_v62  ;;  %v1458_v3 = vsel %vm1330_vm12, %v1266_v56, %v1394_v63  ;;  %v1392_v40 = vmul.f32 0.1, %v1264_v58  ;;  %v1423_v4 = vsel %vm1295_vm10, %v1231_v53, %v1359_v60 }
 0x143   : > { %v2150_v5 = vpack.c.bf16 %v1426_v2, %v1425_v59  ;;  %v2230_v6 = vpack.c.bf16 %v1458_v3, %v1457_v0  ;;  %v1424_v7 = vsel %vm1296_vm14, %v1232_v57, %v1360_v1  ;;  %v1455_v8 = vsel %vm1327_vm13, %v1263_v54, %v1391_v61 }
 0x144   : > { %v2145_v9 = vpack.c.bf16 %v1424_v7, %v1423_v4  ;;  %v1456_v10 = vsel %vm1328_vm15, %v1264_v58, %v1392_v40 }
 0x145   : > { %2246 = vst [vmem:[%s2611_s17 + $0x78] sm:$0xff] %v2150_v5   ;;  %2262 = vst [vmem:[%s2611_s17 + $0xf8] sm:$0xff] %v2230_v6   ;;  %v2225_v11 = vpack.c.bf16 %v1456_v10, %v1455_v8 }
 0x146   : > { %2245 = vst [vmem:[%s2611_s17 + $0x70] sm:$0xff] %v2145_v9  }
 0x147   : > { %2261 = vst [vmem:[%s2611_s17 + $0xf0] sm:$0xff] %v2225_v11  }
 0x148 PF: > { %s13_s14 = sadd.s32 1, %s2485_s14   ;;  %s2721_s12 = smov %s2481_s13 }
 0x149   : > { %p10_p5 = scmp.ge.s32.totalorder %s13_s14, 4   ;;  %s2722_s13 = smov %s2724_s15 }
 0x14b   :  { %12 = sbr.rel (!%p10_p5) target bundleno = 2 (0x2), region = 76 }

</bundles_post_ra>
